<compile_context>
chip_gen: v7x
topology: tpu7x:2x2x1
jax: 0.10.0
libtpu: 0.0.40
codegen_flags: <defaults>
</compile_context>

<pallas_src>
import math

import jax
import jax.numpy as jnp
from jax.experimental import pallas as pl
from jax.experimental.pallas import tpu as pltpu


def _round_up(n, m):
    return ((n + m - 1) // m) * m


def actor_kernel(x_ref, w1_ref, b1_ref, w2_ref, b2_ref, w3_ref, b3_ref, o_ref):
    """One batch tile: relu(xW1+b1) -> relu(.W2+b2) -> sigmoid(.W3+b3)."""
    w_dtype = w1_ref.dtype                     # bf16 by default (all TPU gens)
    x = x_ref[...].astype(w_dtype)             # MXU operands in weight dtype

    h1 = jnp.dot(x, w1_ref[...], preferred_element_type=jnp.float32)
    h1 = jnp.maximum(h1 + b1_ref[...], 0.0)    # f32 VPU (v5e has no bf16 VPU)

    h2 = jnp.dot(h1.astype(w_dtype), w2_ref[...],
                 preferred_element_type=jnp.float32)
    h2 = jnp.maximum(h2 + b2_ref[...], 0.0)    # f32 VPU

    z = jnp.dot(h2.astype(w_dtype), w3_ref[...],
                preferred_element_type=jnp.float32)
    o_ref[...] = jax.nn.sigmoid(z + b3_ref[...]).astype(o_ref.dtype)  # f32 EUP


def _choose_batch_tile(batch, block_rows):
    """Batch tile: multiple of 8 sublanes; >=2 grid steps when batch >= 16 so
    v7x's two TensorCores both get work (harmless on v5e/v6e)."""
    block_rows = max(8, (block_rows // 8) * 8)
    batch8 = _round_up(batch, 8)
    if batch8 > block_rows:
        return block_rows
    if batch8 >= 16:
        return _round_up((batch8 + 1) // 2, 8)   # split a single tile in two
    return batch8


def actor_forward(x, params, *, block_rows=2048, out_dtype=jnp.float32):
    """x: (batch, state_dim) f32 (or bf16). Returns (batch, action_dim) out_dtype.

    For many tiny per-agent batches, stack them on the batch axis and make a
    single call: weight DMA is then amortized across all rows.
    """
    batch, s_in = x.shape
    w1, b1 = params["w1"], params["b1"]
    w2, b2 = params["w2"], params["b2"]
    w3, b3 = params["w3"], params["b3"]
    S8, H_pad = w1.shape                      # S8 = round_up(state_dim, 8)
    A_pad = w3.shape[1]
    action_dim = params["action_dim"]
    assert s_in <= S8

    tb = _choose_batch_tile(batch, block_rows)
    batch_p = _round_up(_round_up(batch, 8), tb)
    grid = (batch_p // tb,)

    # Pad x only if required (batch remainder or sublane-align of features);
    # write the padded copy directly in the compute dtype to halve its bytes.
    compute_dtype = w1.dtype
    if batch_p != batch or S8 != s_in:
        x_in = (jnp.zeros((batch_p, S8), compute_dtype)
                .at[:batch, :s_in].set(x.astype(compute_dtype)))
    else:
        x_in = x                               # no extra HBM pass

    wbytes = jnp.dtype(w1.dtype).itemsize
    xbytes = jnp.dtype(x_in.dtype).itemsize
    obytes = jnp.dtype(out_dtype).itemsize
    flops = 2 * batch_p * (S8 * H_pad + H_pad * H_pad + H_pad * A_pad)
    transcendentals = batch_p * A_pad
    bytes_accessed = (xbytes * batch_p * S8 + obytes * batch_p * A_pad
                      + wbytes * (S8 * H_pad + H_pad * H_pad + H_pad * A_pad)
                      + 4 * (2 * H_pad + A_pad))

    out = pl.pallas_call(
        actor_kernel,
        out_shape=jax.ShapeDtypeStruct((batch_p, A_pad), out_dtype),
        grid=grid,
        in_specs=[
            pl.BlockSpec((tb, S8), lambda i: (i, 0)),        # x tile (pipelined)
            pl.BlockSpec((S8, H_pad), lambda i: (0, 0)),     # w1 (VMEM-resident)
            pl.BlockSpec((1, H_pad), lambda i: (0, 0)),      # b1 (f32)
            pl.BlockSpec((H_pad, H_pad), lambda i: (0, 0)),  # w2
            pl.BlockSpec((1, H_pad), lambda i: (0, 0)),      # b2
            pl.BlockSpec((H_pad, A_pad), lambda i: (0, 0)),  # w3
            pl.BlockSpec((1, A_pad), lambda i: (0, 0)),      # b3
        ],
        out_specs=pl.BlockSpec((tb, A_pad), lambda i: (i, 0)),  # lane-dense store
        compiler_params=pltpu.CompilerParams(
            dimension_semantics=("parallel",)),              # megacore on v7x
        cost_estimate=pl.CostEstimate(
            flops=flops,
            transcendentals=transcendentals,
            bytes_accessed=bytes_accessed),
    )(x_in, w1, b1, w2, b2, w3, b3)

    return out[:batch, :action_dim]


def init_actor_params(key, state_dim, action_dim, hidden_dim,
                      weight_dtype=jnp.bfloat16):
    """nn.Linear-style init (uniform +-1/sqrt(fan_in)).

    Weights are stored transposed (in_features, out_features).  state_dim is
    padded only to a sublane multiple of 8; hidden/action dims are zero-padded
    to multiples of 128 so matmuls and stores stay lane-dense.  Padding is
    mathematically inert (zero rows/cols; padded output lanes are sliced off).
    Weights default to bf16 on ALL generations (v5e's MXU takes bf16 operands;
    bias-add/activations stay f32).  Unpadded f32 originals are kept under
    'ref_*' for the pure-JAX reference.
    """
    keys = jax.random.split(key, 6)

    def linear(kw, kb, fan_in, fan_out):
        bound = 1.0 / math.sqrt(fan_in)
        w = jax.random.uniform(kw, (fan_in, fan_out), jnp.float32, -bound, bound)
        b = jax.random.uniform(kb, (1, fan_out), jnp.float32, -bound, bound)
        return w, b

    w1, b1 = linear(keys[0], keys[1], state_dim, hidden_dim)
    w2, b2 = linear(keys[2], keys[3], hidden_dim, hidden_dim)
    w3, b3 = linear(keys[4], keys[5], hidden_dim, action_dim)

    S8 = _round_up(state_dim, 8)          # sublane-align only (no 8x lane pad)
    H_pad = _round_up(hidden_dim, 128)
    A_pad = _round_up(action_dim, 128)

    def pad_w(w, rows, cols, dtype):
        out = jnp.zeros((rows, cols), jnp.float32).at[:w.shape[0], :w.shape[1]].set(w)
        return out.astype(dtype)

    def pad_b(b, cols):                   # biases stay f32 (added on the VPU)
        return jnp.zeros((1, cols), jnp.float32).at[:, :b.shape[1]].set(b)

    return {
        "w1": pad_w(w1, S8, H_pad, weight_dtype), "b1": pad_b(b1, H_pad),
        "w2": pad_w(w2, H_pad, H_pad, weight_dtype), "b2": pad_b(b2, H_pad),
        "w3": pad_w(w3, H_pad, A_pad, weight_dtype), "b3": pad_b(b3, A_pad),
        "state_dim": state_dim, "action_dim": action_dim, "hidden_dim": hidden_dim,
        "ref_w1": w1, "ref_b1": b1,
        "ref_w2": w2, "ref_b2": b2,
        "ref_w3": w3, "ref_b3": b3,
    }


def actor_ref(x, params):
    """Pure-JAX f32 reference on the UNPADDED weights (matches PyTorch forward)."""
    h1 = jnp.maximum(x @ params["ref_w1"] + params["ref_b1"], 0.0)
    h2 = jnp.maximum(h1 @ params["ref_w2"] + params["ref_b2"], 0.0)
    return jax.nn.sigmoid(h2 @ params["ref_w3"] + params["ref_b3"])


if __name__ == "__main__":
    # Small shapes consistent with the MADDPG actor.
    batch, state_dim, action_dim, hidden_dim = 8, 16, 4, 32

    key = jax.random.PRNGKey(0)
    k_params, k_x1, k_x2 = jax.random.split(key, 3)
    params_bf16 = init_actor_params(k_params, state_dim, action_dim, hidden_dim)
    params_f32 = init_actor_params(k_params, state_dim, action_dim, hidden_dim,
                                   weight_dtype=jnp.float32)

    x1 = jax.random.normal(k_x1, (batch, state_dim), jnp.float32)
    x2 = jax.random.normal(k_x2, (300, state_dim), jnp.float32)

    # Case 1: default bf16 weights, tiny batch (single grid step).
    out1 = jax.block_until_ready(actor_forward(x1, params_bf16))
    ref1 = jax.block_until_ready(actor_ref(x1, params_f32))
    assert out1.shape == (batch, action_dim)
    assert jnp.allclose(out1, ref1, atol=2e-2, rtol=2e-2), "bf16 mismatch (batch=8)"

    # Case 2: default bf16 weights, non-divisible batch -> 2-step parallel grid
    # (exercises the v7x megacore split + batch padding path).
    out2 = jax.block_until_ready(actor_forward(x2, params_bf16))
    ref2 = jax.block_until_ready(actor_ref(x2, params_f32))
    assert out2.shape == (300, action_dim)
    assert jnp.allclose(out2, ref2, atol=2e-2, rtol=2e-2), "bf16 mismatch (batch=300)"

    # Case 3: f32 weights, forced small tile -> 3-step grid; tight tolerance.
    out3 = jax.block_until_ready(actor_forward(x2, params_f32, block_rows=128))
    assert jnp.allclose(out3, ref2, atol=2e-5, rtol=2e-5), "f32 mismatch (gridded)"

    # Case 4: bf16 output path (halves padded-output writeback on v5e).
    out4 = jax.block_until_ready(
        actor_forward(x1, params_f32, out_dtype=jnp.bfloat16))
    assert out4.dtype == jnp.bfloat16
    assert jnp.allclose(out4.astype(jnp.float32), ref1, atol=8e-3), "bf16-out mismatch"

    print("KERNEL_OK")
</pallas_src>

<mosaic_0001>
module attributes {stable_mosaic.version = 11 : i64} {
  func.func @actor_kernel(%arg0: i32, %arg1: memref<8x16xf32, #tpu.memory_space<vmem>>, %arg2: memref<16x128xbf16, #tpu.memory_space<vmem>>, %arg3: memref<1x128xf32, #tpu.memory_space<vmem>>, %arg4: memref<128x128xbf16, #tpu.memory_space<vmem>>, %arg5: memref<1x128xf32, #tpu.memory_space<vmem>>, %arg6: memref<128x128xbf16, #tpu.memory_space<vmem>>, %arg7: memref<1x128xf32, #tpu.memory_space<vmem>>, %arg8: memref<8x128xf32, #tpu.memory_space<vmem>>) attributes {dimension_semantics = [#tpu.dimension_semantics<parallel>], iteration_bounds = array<i64: 1>, scalar_prefetch = 0 : i64, scratch_operands = 0 : i64, tpu.core_type = #tpu.core_type<tc>, window_params = [{transform_indices = @transform_0, window_bounds = array<i64: 8, 16>}, {pipeline_mode = #tpu.pipeline_mode<synchronous>, transform_indices = @transform_1, window_bounds = array<i64: 16, 128>}, {pipeline_mode = #tpu.pipeline_mode<synchronous>, transform_indices = @transform_2, window_bounds = array<i64: 1, 128>}, {pipeline_mode = #tpu.pipeline_mode<synchronous>, transform_indices = @transform_3, window_bounds = array<i64: 128, 128>}, {pipeline_mode = #tpu.pipeline_mode<synchronous>, transform_indices = @transform_4, window_bounds = array<i64: 1, 128>}, {pipeline_mode = #tpu.pipeline_mode<synchronous>, transform_indices = @transform_5, window_bounds = array<i64: 128, 128>}, {pipeline_mode = #tpu.pipeline_mode<synchronous>, transform_indices = @transform_6, window_bounds = array<i64: 1, 128>}, {transform_indices = @transform_7, window_bounds = array<i64: 8, 128>}]} {
    %c0 = arith.constant 0 : index
    %c0_0 = arith.constant 0 : index
    %0 = vector.load %arg1[%c0, %c0_0] : memref<8x16xf32, #tpu.memory_space<vmem>>, vector<8x16xf32>
    %1 = arith.truncf %0 : vector<8x16xf32> to vector<8x16xbf16>
    %c0_1 = arith.constant 0 : index
    %c0_2 = arith.constant 0 : index
    %2 = vector.load %arg2[%c0_1, %c0_2] : memref<16x128xbf16, #tpu.memory_space<vmem>>, vector<16x128xbf16>
    %cst = arith.constant dense<0.000000e+00> : vector<8x128xf32>
    %3 = tpu.matmul %1, %2, %cst {dimension_numbers = #tpu.dot_dimension_numbers<[1], [0], [0], [1], [0, 0, 1, 1], [], []>} : vector<8x16xbf16>, vector<16x128xbf16>, vector<8x128xf32> -> vector<8x128xf32>
    %c0_3 = arith.constant 0 : index
    %c0_4 = arith.constant 0 : index
    %4 = vector.load %arg3[%c0_3, %c0_4] : memref<1x128xf32, #tpu.memory_space<vmem>>, vector<1x128xf32>
    %5 = vector.broadcast %4 : vector<1x128xf32> to vector<8x128xf32>
    %6 = arith.addf %3, %5 : vector<8x128xf32>
    %cst_5 = arith.constant 0.000000e+00 : f32
    %7 = vector.broadcast %cst_5 : f32 to vector<8x128xf32>
    %8 = arith.maximumf %6, %7 : vector<8x128xf32>
    %9 = arith.truncf %8 : vector<8x128xf32> to vector<8x128xbf16>
    %c0_6 = arith.constant 0 : index
    %c0_7 = arith.constant 0 : index
    %10 = vector.load %arg4[%c0_6, %c0_7] : memref<128x128xbf16, #tpu.memory_space<vmem>>, vector<128x128xbf16>
    %cst_8 = arith.constant dense<0.000000e+00> : vector<8x128xf32>
    %11 = tpu.matmul %9, %10, %cst_8 {dimension_numbers = #tpu.dot_dimension_numbers<[1], [0], [0], [1], [0, 0, 1, 1], [], []>} : vector<8x128xbf16>, vector<128x128xbf16>, vector<8x128xf32> -> vector<8x128xf32>
    %c0_9 = arith.constant 0 : index
    %c0_10 = arith.constant 0 : index
    %12 = vector.load %arg5[%c0_9, %c0_10] : memref<1x128xf32, #tpu.memory_space<vmem>>, vector<1x128xf32>
    %13 = vector.broadcast %12 : vector<1x128xf32> to vector<8x128xf32>
    %14 = arith.addf %11, %13 : vector<8x128xf32>
    %cst_11 = arith.constant 0.000000e+00 : f32
    %15 = vector.broadcast %cst_11 : f32 to vector<8x128xf32>
    %16 = arith.maximumf %14, %15 : vector<8x128xf32>
    %17 = arith.truncf %16 : vector<8x128xf32> to vector<8x128xbf16>
    %c0_12 = arith.constant 0 : index
    %c0_13 = arith.constant 0 : index
    %18 = vector.load %arg6[%c0_12, %c0_13] : memref<128x128xbf16, #tpu.memory_space<vmem>>, vector<128x128xbf16>
    %cst_14 = arith.constant dense<0.000000e+00> : vector<8x128xf32>
    %19 = tpu.matmul %17, %18, %cst_14 {dimension_numbers = #tpu.dot_dimension_numbers<[1], [0], [0], [1], [0, 0, 1, 1], [], []>} : vector<8x128xbf16>, vector<128x128xbf16>, vector<8x128xf32> -> vector<8x128xf32>
    %c0_15 = arith.constant 0 : index
    %c0_16 = arith.constant 0 : index
    %20 = vector.load %arg7[%c0_15, %c0_16] : memref<1x128xf32, #tpu.memory_space<vmem>>, vector<1x128xf32>
    %21 = vector.broadcast %20 : vector<1x128xf32> to vector<8x128xf32>
    %22 = arith.addf %19, %21 : vector<8x128xf32>
    %23 = arith.negf %22 : vector<8x128xf32>
    %24 = math.exp %23 : vector<8x128xf32>
    %cst_17 = arith.constant 1.000000e+00 : f32
    %25 = vector.broadcast %cst_17 : f32 to vector<8x128xf32>
    %26 = arith.addf %25, %24 : vector<8x128xf32>
    %27 = arith.divf %25, %26 : vector<8x128xf32>
    %c0_18 = arith.constant 0 : index
    %c0_19 = arith.constant 0 : index
    %28 = vector.load %arg8[%c0_18, %c0_19] : memref<8x128xf32, #tpu.memory_space<vmem>>, vector<8x128xf32>
    tpu.vector_store %arg8[%c0_18, %c0_19], %27 {strides = array<i32>} : memref<8x128xf32, #tpu.memory_space<vmem>>, vector<8x128xf32>,
    return
  }
  func.func @transform_0(%arg0: i32) -> (i32, i32) {
    %c0_i32 = arith.constant 0 : i32
    %c0_i32_0 = arith.constant 0 : i32
    return %arg0, %c0_i32 : i32, i32
  }
  func.func @transform_1(%arg0: i32) -> (i32, i32) {
    %c0_i32 = arith.constant 0 : i32
    %c0_i32_0 = arith.constant 0 : i32
    %c0_i32_1 = arith.constant 0 : i32
    return %c0_i32, %c0_i32_0 : i32, i32
  }
  func.func @transform_2(%arg0: i32) -> (i32, i32) {
    %c0_i32 = arith.constant 0 : i32
    %c0_i32_0 = arith.constant 0 : i32
    %c0_i32_1 = arith.constant 0 : i32
    return %c0_i32, %c0_i32_0 : i32, i32
  }
  func.func @transform_3(%arg0: i32) -> (i32, i32) {
    %c0_i32 = arith.constant 0 : i32
    %c0_i32_0 = arith.constant 0 : i32
    %c0_i32_1 = arith.constant 0 : i32
    return %c0_i32, %c0_i32_0 : i32, i32
  }
  func.func @transform_4(%arg0: i32) -> (i32, i32) {
    %c0_i32 = arith.constant 0 : i32
    %c0_i32_0 = arith.constant 0 : i32
    %c0_i32_1 = arith.constant 0 : i32
    return %c0_i32, %c0_i32_0 : i32, i32
  }
  func.func @transform_5(%arg0: i32) -> (i32, i32) {
    %c0_i32 = arith.constant 0 : i32
    %c0_i32_0 = arith.constant 0 : i32
    %c0_i32_1 = arith.constant 0 : i32
    return %c0_i32, %c0_i32_0 : i32, i32
  }
  func.func @transform_6(%arg0: i32) -> (i32, i32) {
    %c0_i32 = arith.constant 0 : i32
    %c0_i32_0 = arith.constant 0 : i32
    %c0_i32_1 = arith.constant 0 : i32
    return %c0_i32, %c0_i32_0 : i32, i32
  }
  func.func @transform_7(%arg0: i32) -> (i32, i32) {
    %c0_i32 = arith.constant 0 : i32
    %c0_i32_0 = arith.constant 0 : i32
    return %arg0, %c0_i32 : i32, i32
  }
}

</mosaic_0001>

<bundles_post_ra>
// kernel: tpu_custom_call.1
= control target key start
LH: loop header
LB: loop body
LE: loop exit
PB: predicated region body
PF: predicated region fallthrough
CT: control target
= control target key end

     0   :  { %12 = vsyncpa [#allocation3], 0  ;;  %s775_s0 = inlined_call_operand.hbm [shape: f32[8,16], index: 0, kind: input, shape index: {}]   ;;  %s776_s1 = inlined_call_operand.hbm [shape: bf16[16,128], index: 1, kind: input, shape index: {}]   ;;  %s777_s2 = inlined_call_operand.vmem [shape: f32[1,128], index: 2, kind: input, shape index: {}]   ;;  %s778_s3 = inlined_call_operand.hbm [shape: bf16[128,128], index: 3, kind: input, shape index: {}]   ;;  %s779_s4 = inlined_call_operand.vmem [shape: f32[1,128], index: 4, kind: input, shape index: {}]   ;;  %s780_s5 = inlined_call_operand.hbm [shape: bf16[128,128], index: 5, kind: input, shape index: {}]   ;;  %s781_s6 = inlined_call_operand.vmem [shape: f32[1,128], index: 6, kind: input, shape index: {}]   ;;  %s782_s7 = inlined_call_operand.hbm [shape: f32[8,128], index: 7, kind: output, shape index: {}]  }
   0x1   :  { %13 = vsyncpa [#allocation6], 0 }
   0x2   :  { %14 = vsyncpa [#allocation9], 0 }
   0x3   :  { %15 = vsyncpa [#allocation4], 0  ;;  %s628_s24 = smov [#allocation5]   ;;  %s510_s28 = scalar_lea.hbm %s776_s1, 128 }
   0x4   :  { %s31_s25 = sshll.u32 %s628_s24, 4  ;;  %p511_p0 = scmp.ne.s32.totalorder %s776_s1, %s510_s28  ;;  %s32_s25 = int_to_ptr.vmem [resolvable:$true] %s31_s25 }
   0x5   :  { %p514_p1 = scmp.lt.u32.totalorder %s510_s28, %s776_s1 }
   0x7   :  { %p516_p2 = pnand %p514_p1, %p511_p0 }
   0x9   :  { %519 = shalt.err (!%p516_p2)
}
   0xa   :  { %s520_s10 = scalar_lea.vmem %s32_s25, 128  ;;  %p525_p4 = scmp.lt.s32.totalorder %s32_s25, %s32_s25 }
   0xb   :  { %p521_p3 = scmp.ne.s32.totalorder %s32_s25, %s520_s10  ;;  %p526_p5 = scmp.lt.s32.totalorder %s520_s10, %s520_s10 }
   0xd   :  { %p527_p6 = por %p526_p5, %p525_p4 }
   0xf   :  { %p528_p7 = pnand %p527_p6, %p521_p3 }
  0x11   :  { %531 = shalt.err (!%p528_p7)
}
  0x12   :  { %s629_s11 = smov 64   ;;  %s630_s12 = smov 4  }
  0x13   :  { %37 = dma.hbm_to_vmem [thread:$0]  %s776_s1, 128, %s32_s25, [#allocation6], %s629_s11, %s629_s11, %s630_s12  }
  0x14   :  { %s631_s15 = smov [#allocation2]   ;;  %s632_s17 = smov [#allocation7]  }
  0x15   :  { %s22_s16 = sshll.u32 %s631_s15, 4  ;;  %s45_s18 = sshll.u32 %s632_s17, 4  ;;  %s23_s16 = int_to_ptr.vmem [resolvable:$true] %s22_s16  ;;  %s46_s18 = int_to_ptr.vmem [resolvable:$true] %s45_s18 }
  0x16   :  { %s532_s21 = scalar_lea.hbm %s775_s0, 128 }
  0x17   :  { %p533_p8 = scmp.ne.s32.totalorder %s775_s0, %s532_s21  ;;  %p536_p9 = scmp.lt.u32.totalorder %s532_s21, %s775_s0 }
  0x19   :  { %p538_p10 = pnand %p536_p9, %p533_p8 }
  0x1b   :  { %541 = shalt.err (!%p538_p10)
}
  0x1c   :  { %s542_s1 = scalar_lea.vmem %s23_s16, 128  ;;  %p547_p12 = scmp.lt.s32.totalorder %s23_s16, %s23_s16 }
  0x1d   :  { %p543_p11 = scmp.ne.s32.totalorder %s23_s16, %s542_s1  ;;  %p548_p13 = scmp.lt.s32.totalorder %s542_s1, %s542_s1 }
  0x1f   :  { %p549_p0 = por %p548_p13, %p547_p12 }
  0x21   :  { %p550_p1 = pnand %p549_p0, %p543_p11 }
  0x23   :  { %553 = shalt.err (!%p550_p1)
}
  0x24   :  { %25 = dma.hbm_to_vmem [thread:$0]  %s775_s0, 128, %s23_s16, [#allocation3]  }
  0x25   :  { %s554_s30 = scalar_lea.hbm %s778_s3, 1024 }
  0x26   :  { %p555_p2 = scmp.ne.s32.totalorder %s778_s3, %s554_s30  ;;  %p558_p3 = scmp.lt.u32.totalorder %s554_s30, %s778_s3 }
  0x28   :  { %p560_p4 = pnand %p558_p3, %p555_p2 }
  0x2a   :  { %563 = shalt.err (!%p560_p4)
}
  0x2b   :  { %s564_s14 = scalar_lea.vmem %s46_s18, 1024  ;;  %p569_p6 = scmp.lt.s32.totalorder %s46_s18, %s46_s18 }
  0x2c   :  { %p565_p5 = scmp.ne.s32.totalorder %s46_s18, %s564_s14  ;;  %p570_p7 = scmp.lt.s32.totalorder %s564_s14, %s564_s14 }
  0x2e   :  { %p571_p8 = por %p570_p7, %p569_p6 }
  0x30   :  { %p572_p9 = pnand %p571_p8, %p565_p5 }
  0x32   :  { %575 = shalt.err (!%p572_p9)
}
  0x33   :  { %51 = dma.hbm_to_vmem [thread:$0]  %s778_s3, 1024, %s46_s18, [#allocation6], %s629_s11, %s629_s11, %s630_s12  }
  0x34   :  { %s633_s16 = smov [#allocation8]   ;;  %s576_s21 = scalar_lea.hbm %s780_s5, 1024 }
  0x35   :  { %s59_s17 = sshll.u32 %s633_s16, 4  ;;  %p577_p10 = scmp.ne.s32.totalorder %s780_s5, %s576_s21  ;;  %s60_s17 = int_to_ptr.vmem [resolvable:$true] %s59_s17 }
  0x36   :  { %p580_p11 = scmp.lt.u32.totalorder %s576_s21, %s780_s5 }
  0x38   :  { %p582_p12 = pnand %p580_p11, %p577_p10 }
  0x3a   :  { %585 = shalt.err (!%p582_p12)
}
  0x3b   :  { %s586_s1 = scalar_lea.vmem %s60_s17, 1024  ;;  %p591_p0 = scmp.lt.s32.totalorder %s60_s17, %s60_s17 }
  0x3c   :  { %p587_p13 = scmp.ne.s32.totalorder %s60_s17, %s586_s1  ;;  %p592_p1 = scmp.lt.s32.totalorder %s586_s1, %s586_s1 }
  0x3e   :  { %p593_p2 = por %p592_p1, %p591_p0 }
  0x40   :  { %p594_p3 = pnand %p593_p2, %p587_p13 }
  0x42   :  { %597 = shalt.err (!%p594_p3)
}
  0x43   :  { %65 = dma.hbm_to_vmem [thread:$0]  %s780_s5, 1024, %s60_s17, [#allocation9], %s629_s11, %s629_s11, %s630_s12  }
  0x44   :  { %620 = dma.done.wait [#allocation3], 128  }
  0x45   :  { %621 = vsyncadd [#allocation3], 4294967168 }
  0x46   :  { %622 = dma.done.wait [#allocation6], 1152  }
  0x47   :  { %623 = vsyncadd [#allocation6], 4294966144 }
  0x48   :  { %624 = dma.done.wait [#allocation9], 1024  }
  0x49   :  { %625 = vsyncadd [#allocation9], 4294966272  ;;  %v634_v0 = vmov 0.0   ;;  %vm635_vm0 = vmmov 0   ;;  %v489_v1 = vld [vmem:[#allocation5] sm:$0xff]   ;;  %v81_v2 = vld [vmem:[#allocation2] sm:$0xff] }
  0x4a   :  { %434 = vmatprep.subr.bf16.mxu0 %v634_v0  ;;  %436 = vmatprep.mubr.msk.bf16.mxu0 %vm635_vm0, %v634_v0  ;;  %v82_v3 = vpack.c.bf16 %v81_v2, %v81_v2  ;;  %vm98_vm1 = vcmask 130048   ;;  %v490_v4 = vld [vmem:[#allocation7] sm:$0xff]   ;;  %v491_v5 = vld [vmem:[#allocation7 + $0x8] sm:$0xff]   ;;  %v492_v6 = vld [vmem:[#allocation7 + $0x10] sm:$0xff]  }
  0x4b   :  { %440 = vmatprep.subr.bf16.mxu1 %v634_v0  ;;  %456 = vmatprep.mubr.msk.bf16.mxu1 %vm635_vm0, %v634_v0  ;;  %v493_v7 = vld [vmem:[#allocation7 + $0x18] sm:$0xff]   ;;  %v494_v8 = vld [vmem:[#allocation7 + $0x20] sm:$0xff]   ;;  %v495_v9 = vld [vmem:[#allocation7 + $0x28] sm:$0xff]  }
  0x4c   :  { %435 = vmatpush3.bf16.msra.mxu0 %v489_v1  ;;  %441 = vmatpush3.bf16.msra.mxu1 %v490_v4  ;;  %v496_v10 = vld [vmem:[#allocation7 + $0x30] sm:$0xff]   ;;  %v497_v11 = vld [vmem:[#allocation7 + $0x38] sm:$0xff]   ;;  %v498_v12 = vld [vmem:[#allocation8] sm:$0xff]  }
  0x4d   :  { %460 = vmatprep.subr.bf16.mxu0 %v634_v0  ;;  %442 = vmatprep.subr.bf16.mxu1 %v634_v0  ;;  %v499_v13 = vld [vmem:[#allocation8 + $0x8] sm:$0xff]   ;;  %v500_v14 = vld [vmem:[#allocation8 + $0x10] sm:$0xff]   ;;  %v501_v15 = vld [vmem:[#allocation8 + $0x18] sm:$0xff]  }
  0x4e   :  { %v502_v16 = vld [vmem:[#allocation8 + $0x20] sm:$0xff]   ;;  %v503_v17 = vld [vmem:[#allocation8 + $0x28] sm:$0xff]   ;;  %v392_v18 = vld [vmem:[%s777_s2] ss:$0 sm:$0xff] }
  0x4f   :  { %437 = vmatmul.mubr.msk.bf16.vlgmr.msra.gmra.mrb[0].mxu0 %vm98_vm1, %v82_v3  ;;  %v504_v26 = vld [vmem:[#allocation8 + $0x30] sm:$0xff]   ;;  %v505_v27 = vld [vmem:[#allocation8 + $0x38] sm:$0xff]  }
  0x50   :  { %476 = vmatprep.mubr.msk.bf16.mxu0 %vm635_vm0, %v634_v0  ;;  %443 = vmatpush3.bf16.msra.mxu1 %v491_v5  ;;  %v395_v28 = vld [vmem:[%s779_s4] ss:$0 sm:$0xff]  ;;  %s636_s4 = smov [#allocation10]  }
  0x51   :  { %444 = vmatprep.subr.bf16.mxu1 %v634_v0  ;;  %461 = vmatpush3.bf16.msra.mxu0 %v498_v12  ;;  %v404_v36 = vld [vmem:[%s781_s6] ss:$0 sm:$0xff]  ;;  %s381_s28 = sshll.u32 %s636_s4, 4  ;;  %s382_s28 = int_to_ptr.vmem [resolvable:$true] %s381_s28 }
  0x52   :  { %462 = vmatprep.subr.bf16.mxu0 %v634_v0  ;;  %s598_s29 = scalar_lea.vmem %s382_s28, 128  ;;  %p603_p5 = scmp.lt.s32.totalorder %s382_s28, %s382_s28 }
  0x53   :  { %p599_p4 = scmp.ne.s32.totalorder %s382_s28, %s598_s29  ;;  %p604_p6 = scmp.lt.s32.totalorder %s598_s29, %s598_s29 }
  0x54   :  { %445 = vmatpush3.bf16.msra.mxu1 %v492_v6 }
  0x55   :  { %446 = vmatprep.subr.bf16.mxu1 %v634_v0  ;;  %463 = vmatpush3.bf16.msra.mxu0 %v499_v13  ;;  %p605_p7 = por %p604_p6, %p603_p5 }
  0x56   :  { %464 = vmatprep.subr.bf16.mxu0 %v634_v0 }
  0x57   :  { %p606_p8 = pnand %p605_p7, %p599_p4 }
  0x58   :  { %447 = vmatpush3.bf16.msra.mxu1 %v493_v7 }
  0x59   :  { %448 = vmatprep.subr.bf16.mxu1 %v634_v0  ;;  %465 = vmatpush3.bf16.msra.mxu0 %v500_v14 }
  0x5a   :  { %466 = vmatprep.subr.bf16.mxu0 %v634_v0 }
  0x5c   :  { %449 = vmatpush3.bf16.msra.mxu1 %v494_v8 }
  0x5d   :  { %450 = vmatprep.subr.bf16.mxu1 %v634_v0  ;;  %467 = vmatpush3.bf16.msra.mxu0 %v501_v15 }
  0x5e   :  { %468 = vmatprep.subr.bf16.mxu0 %v634_v0 }
  0x60   :  { %451 = vmatpush3.bf16.msra.mxu1 %v495_v9 }
  0x61   :  { %452 = vmatprep.subr.bf16.mxu1 %v634_v0  ;;  %469 = vmatpush3.bf16.msra.mxu0 %v502_v16 }
  0x62   :  { %470 = vmatprep.subr.bf16.mxu0 %v634_v0 }
  0x64   :  { %453 = vmatpush3.bf16.msra.mxu1 %v496_v10 }
  0x65   :  { %454 = vmatprep.subr.bf16.mxu1 %v634_v0  ;;  %471 = vmatpush3.bf16.msra.mxu0 %v503_v17 }
  0x66   :  { %472 = vmatprep.subr.bf16.mxu0 %v634_v0 }
  0x68   :  { %455 = vmatpush3.bf16.msra.mxu1 %v497_v11 }
  0x69   :  { %473 = vmatpush3.bf16.msra.mxu0 %v504_v26 }
  0x6a   :  { %474 = vmatprep.subr.bf16.mxu0 %v634_v0 }
  0x6d   :  { %475 = vmatpush3.bf16.msra.mxu0 %v505_v27 }
 0x122   :  { %v136_v19 = vpop.f32.mrb[0].mxu0 }
 0x123   :  { %v137_v20 = vadd.f32 %v392_v18, %v136_v19  ;;  %v438_v21 = vpop.f32.mrb[1].mxu0 }
 0x124   :  { %v139_v22 = vpop.f32.mrb[2].mxu0 }
 0x125   :  { %v142_v23 = vmax.f32 %v137_v20, 0.0  ;;  %v439_v24 = vpop.f32.mrb[3].mxu0 }
 0x127   :  { %v143_v25 = vpack.c.bf16 %v142_v23, %v142_v23 }
 0x129   :  { %457 = vmatmul.mubr.bf16.vlgmr.msra.gmra.mrb[0].mxu1 %v143_v25 }
 0x1fc   :  { %v249_v29 = vpop.f32.mrb[0].mxu1 }
 0x1fd   :  { %v250_v30 = vadd.f32 %v395_v28, %v249_v29  ;;  %v458_v31 = vpop.f32.mrb[1].mxu1 }
 0x1fe   :  { %v252_v32 = vpop.f32.mrb[2].mxu1 }
 0x1ff   :  { %v255_v33 = vmax.f32 %v250_v30, 0.0  ;;  %v459_v34 = vpop.f32.mrb[3].mxu1 }
 0x201   :  { %v256_v35 = vpack.c.bf16 %v255_v33, %v255_v33 }
 0x203   :  { %477 = vmatmul.mubr.bf16.vlgmr.msra.gmra.mrb[4].mxu0 %v256_v35 }
 0x2d6   :  { %v362_v37 = vpop.f32.mrb[4].mxu0 }
 0x2d7   :  { %v363_v38 = vadd.f32 %v404_v36, %v362_v37  ;;  %v478_v39 = vpop.f32.mrb[5].mxu0 }
 0x2d8   :  { %v365_v40 = vpop.f32.mrb[6].mxu0 }
 0x2d9   :  { %v413_v41 = vmul.f32 -1.442695, %v363_v38  ;;  %v479_v42 = vpop.f32.mrb[7].mxu0 }
 0x2db   :  { %506 = vpow2.f32 %v413_v41 }
 0x2e5   :  { %v507_v43 = vpop.eup %506 }
 0x2e6   :  { %v371_v44 = vadd.f32 1.0, %v507_v43 }
 0x2e8   :  { %508 = vrcp.f32 %v371_v44 }
 0x2f2   :  { %v509_v45 = vpop.eup %508 }
 0x2f3   :  { %374 = vst [vmem:[#allocation10] sm:$0xff] %v509_v45 }
 0x2f4   :  { %609 = shalt.err (!%p606_p8)
}
 0x2f5   :  { %s610_s8 = scalar_lea.hbm %s782_s7, 128 }
 0x2f6   :  { %p611_p9 = scmp.ne.s32.totalorder %s782_s7, %s610_s8  ;;  %p614_p10 = scmp.lt.u32.totalorder %s610_s8, %s782_s7 }
 0x2f8   :  { %p616_p11 = pnand %p614_p10, %p611_p9 }
 0x2fa   :  { %619 = shalt.err (!%p616_p11)
}
 0x2fb   :  { %384 = dma.vmem_to_hbm [thread:$0]  %s382_s28, 128, %s782_s7, [#allocation4]  }
 0x2fc   :  { %626 = dma.done.wait [#allocation4], 128  }
 0x2fd   :  { %627 = vsyncadd [#allocation4], 4294967168 }
 0x2fe   :  { %388 = vsyncpa [#allocation3], 1 }
 0x2ff   :  { %389 = vsyncpa [#allocation6], 1 }
 0x300   :  { %390 = vsyncpa [#allocation9], 1 }
 0x301   :  { %391 = vsyncpa [#allocation4], 1 }

</bundles_post_ra>
